<compile_context>
chip_gen: v7x
topology: tpu7x:2x2x1
jax: 0.10.0
libtpu: 0.0.40
codegen_flags: <defaults>
</compile_context>

<pallas_src>
import jax
import jax.numpy as jnp
from jax.experimental import pallas as pl
from jax.experimental.pallas import tpu as pltpu

POWER = 2  # Normalize(power=2)

_LANE = 128
_SUBLANE = 8
# Per-block VMEM budget. Pallas double-buffers input and output blocks, so the
# live pipelined footprint is ~4x this -> ~16 MiB, inside the 32 MiB limit we
# request below on every generation (v5e/v6e: 128 MiB physical; v7x: 64 MiB).
_BLOCK_BUDGET_BYTES = 4 * 1024 * 1024
_VMEM_LIMIT_BYTES = 32 * 1024 * 1024


# --------------------------------------------------------------------------
# Normalize (l2_norm) kernels
# --------------------------------------------------------------------------

def _l2norm_channels_kernel(x_ref, o_ref):
    """x_ref / o_ref: (NB, C, T) block. Reduce over the channel (sublane) axis."""
    x = x_ref[...]
    xf = x.astype(jnp.float32)
    # Square-sum always accumulated in f32 (needed on v5e; cheap everywhere).
    sq_sum = jnp.sum(xf * xf, axis=1, keepdims=True)        # (NB, 1, T) f32
    inv_norm = jax.lax.rsqrt(sq_sum)                         # EUP rsqrt (free slot)
    # Multiply in the native dtype: exact for f32, keeps bf16 tiles packed.
    o_ref[...] = (x * inv_norm.astype(x.dtype)).astype(o_ref.dtype)


def _l2norm_rows_kernel(x_ref, o_ref):
    """x_ref / o_ref: (NB, C) block. Reduce over C (lane axis, XLU reduce)."""
    x = x_ref[...]
    xf = x.astype(jnp.float32)
    inv_norm = jax.lax.rsqrt(jnp.sum(xf * xf, axis=-1, keepdims=True))
    o_ref[...] = (x * inv_norm.astype(x.dtype)).astype(o_ref.dtype)


def _choose_tiles_nchw(N, C, HW_pad, itemsize):
    """Pick (batch-fold NB, lane tile T) for the (N, C, HW_pad) layout."""
    # Largest lane tile (multiple of 128) under the per-block budget for NB=1.
    max_lanes = max(_LANE, ((_BLOCK_BUDGET_BYTES // (C * itemsize)) // _LANE) * _LANE)

    # Largest multiple-of-128 divisor of HW_pad that fits the budget.
    n_lane_blocks = HW_pad // _LANE
    t = _LANE
    for d in range(1, n_lane_blocks + 1):
        if n_lane_blocks % d == 0 and d * _LANE <= max_lanes:
            t = d * _LANE

    # If a single lane tile covers all of HW_pad, fold batch elements into the
    # block to amortize the ~0.35 us per-grid-step overhead.
    nb = 1
    if t == HW_pad:
        cap = max(1, _BLOCK_BUDGET_BYTES // (C * t * itemsize))
        for d in range(1, N + 1):
            if N % d == 0 and d <= cap:
                nb = d

    # Keep >= 2 grid steps along a parallel axis when possible so v7x's two
    # TensorCores both get work (no-op on single-core v5e/v6e).
    if (N // nb) * (HW_pad // t) < 2:
        if nb > 1:
            for d in range(nb, 0, -1):
                if N % d == 0 and N // d >= 2:
                    nb = d
                    break
        elif HW_pad // t == 1 and HW_pad >= 2 * _LANE and (HW_pad // 2) % _LANE == 0:
            t = HW_pad // 2

    return nb, t


def _l2_normalize_nchw(x_nchw):
    """(N, C, H, W) -> L2-normalized over C, same shape/dtype."""
    N, C, H, W = x_nchw.shape
    HW = H * W
    itemsize = jnp.dtype(x_nchw.dtype).itemsize

    # Pad the flattened spatial axis to a multiple of 128 so every store is an
    # unmasked lane-dense vst and DMA stays rectangular. Pad value 1.0 keeps
    # the padded columns finite; they are sliced away below.
    HW_pad = ((HW + _LANE - 1) // _LANE) * _LANE
    x3 = x_nchw.reshape(N, C, HW)
    if HW_pad != HW:
        x3 = jnp.pad(x3, ((0, 0), (0, 0), (0, HW_pad - HW)), constant_values=1.0)

    nb, t = _choose_tiles_nchw(N, C, HW_pad, itemsize)
    grid = (N // nb, HW_pad // t)

    cost = pl.CostEstimate(
        flops=3 * N * C * HW_pad,
        transcendentals=N * HW_pad,
        bytes_accessed=2 * N * C * HW_pad * itemsize,
    )

    out3 = pl.pallas_call(
        _l2norm_channels_kernel,
        out_shape=jax.ShapeDtypeStruct((N, C, HW_pad), x_nchw.dtype),
        grid_spec=pltpu.PrefetchScalarGridSpec(
            num_scalar_prefetch=0,
            grid=grid,
            in_specs=[pl.BlockSpec((nb, C, t), lambda i, j: (i, 0, j))],
            out_specs=pl.BlockSpec((nb, C, t), lambda i, j: (i, 0, j)),
        ),
        compiler_params=pltpu.CompilerParams(
            dimension_semantics=("parallel", "parallel"),
            vmem_limit_bytes=_VMEM_LIMIT_BYTES,
        ),
        cost_estimate=cost,
    )(x3)

    if HW_pad != HW:
        out3 = out3[:, :, :HW]
    return out3.reshape(N, C, H, W)


def _l2_normalize_2d(x):
    """(N, C) -> row-wise L2 normalization (how the model uses l2_norm)."""
    N, C = x.shape
    itemsize = jnp.dtype(x.dtype).itemsize

    # Rows per block: the largest multiple-of-8 divisor of N under the VMEM
    # budget when one exists; otherwise take the full batch (block_shape equal
    # to the full dim is always layout-legal).
    nb = N
    if N % _SUBLANE == 0:
        cap = max(_SUBLANE,
                  ((_BLOCK_BUDGET_BYTES // (C * itemsize)) // _SUBLANE) * _SUBLANE)
        blocks = N // _SUBLANE
        best = _SUBLANE
        for d in range(1, blocks + 1):
            if blocks % d == 0 and d * _SUBLANE <= cap:
                best = d * _SUBLANE
        nb = best
    grid = (N // nb,)

    cost = pl.CostEstimate(
        flops=3 * N * C,
        transcendentals=N,
        bytes_accessed=2 * N * C * itemsize,
    )

    return pl.pallas_call(
        _l2norm_rows_kernel,
        out_shape=jax.ShapeDtypeStruct((N, C), x.dtype),
        grid_spec=pltpu.PrefetchScalarGridSpec(
            num_scalar_prefetch=0,
            grid=grid,
            in_specs=[pl.BlockSpec((nb, C), lambda i: (i, 0))],
            out_specs=pl.BlockSpec((nb, C), lambda i: (i, 0)),
        ),
        compiler_params=pltpu.CompilerParams(
            dimension_semantics=("parallel",),
            vmem_limit_bytes=_VMEM_LIMIT_BYTES,
        ),
        cost_estimate=cost,
    )(x)


def l2_normalize(x):
    """Pallas version of Normalize(power=2).forward: normalize over dim 1."""
    if x.ndim == 2:
        return _l2_normalize_2d(x)
    if x.ndim == 4:
        return _l2_normalize_nchw(x)
    raise ValueError(f"unsupported rank {x.ndim}; expected 2 or 4")


# --------------------------------------------------------------------------
# Fused contrastive branch: pool -> Linear -> ReLU -> Linear -> l2_norm
# --------------------------------------------------------------------------

def _contrast_head_kernel(x_ref, w1_ref, b1_ref, w2_ref, b2_ref, o_ref):
    # x_ref: (N, C, HW); w1: (C, C1); b1: (1, C1); w2: (C1, C2); b2: (1, C2);
    # o_ref: (N, C2). Everything stays VMEM-resident; intermediates never hit HBM.
    x = x_ref[...].astype(jnp.float32)
    pooled = jnp.mean(x, axis=-1)                                   # AdaptiveAvgPool2d(1)
    h = jnp.dot(pooled, w1_ref[...].astype(jnp.float32),
                preferred_element_type=jnp.float32) + b1_ref[...].astype(jnp.float32)
    h = jnp.maximum(h, 0.0)                                         # ReLU
    f = jnp.dot(h, w2_ref[...].astype(jnp.float32),
                preferred_element_type=jnp.float32) + b2_ref[...].astype(jnp.float32)
    inv_norm = jax.lax.rsqrt(jnp.sum(f * f, axis=-1, keepdims=True))
    o_ref[...] = (f * inv_norm).astype(o_ref.dtype)


def contrast_feature_head(x_nchw, w1, b1, w2, b2):
    """self.pool + self.mapping{1,2} + self.l2_norm fused into one kernel.

    x_nchw: (N, C, H, W); w1: (C, C1); b1: (C1,); w2: (C1, C2); b2: (C2,).
    Returns (N, C2) L2-normalized feature vectors.
    """
    N, C, H, W = x_nchw.shape
    HW = H * W
    C1 = w1.shape[1]
    C2 = w2.shape[1]
    itemsize = jnp.dtype(x_nchw.dtype).itemsize

    x3 = x_nchw.reshape(N, C, HW)
    b1r = b1.reshape(1, C1)
    b2r = b2.reshape(1, C2)

    cost = pl.CostEstimate(
        flops=N * C * HW + 2 * N * (C * C1 + C1 * C2) + 3 * N * C2,
        transcendentals=N,
        bytes_accessed=(N * C * HW + C * C1 + C1 * C2 + C1 + C2 + N * C2) * itemsize,
    )

    return pl.pallas_call(
        _contrast_head_kernel,
        out_shape=jax.ShapeDtypeStruct((N, C2), x_nchw.dtype),
        grid_spec=pltpu.PrefetchScalarGridSpec(
            num_scalar_prefetch=0,
            grid=(1,),
            in_specs=[
                pl.BlockSpec((N, C, HW), lambda i: (0, 0, 0)),
                pl.BlockSpec((C, C1), lambda i: (0, 0)),
                pl.BlockSpec((1, C1), lambda i: (0, 0)),
                pl.BlockSpec((C1, C2), lambda i: (0, 0)),
                pl.BlockSpec((1, C2), lambda i: (0, 0)),
            ],
            out_specs=pl.BlockSpec((N, C2), lambda i: (0, 0)),
        ),
        compiler_params=pltpu.CompilerParams(
            dimension_semantics=("arbitrary",),
            vmem_limit_bytes=_VMEM_LIMIT_BYTES,
        ),
        cost_estimate=cost,
    )(x3, w1, b1r, w2, b2r)


# --------------------------------------------------------------------------
# Pure-JAX references (mirror the PyTorch forward, power=2)
# --------------------------------------------------------------------------

def _reference_normalize(x):
    norm = jnp.power(jnp.sum(jnp.power(x, POWER), axis=1, keepdims=True), 1.0 / POWER)
    return x / norm


def _reference_head(x, w1, b1, w2, b2):
    pooled = jnp.mean(x, axis=(2, 3))
    h = jnp.maximum(pooled @ w1 + b1, 0.0)
    f = h @ w2 + b2
    return _reference_normalize(f)


if __name__ == "__main__":
    key = jax.random.PRNGKey(0)
    ks = jax.random.split(key, 8)

    # (a) l2_norm exactly as used in forward(): (N, 128) contrastive features.
    feats = jax.random.normal(ks[0], (2, 128), dtype=jnp.float32)
    out = jax.block_until_ready(l2_normalize(feats))
    assert out.shape == feats.shape and out.dtype == feats.dtype
    assert jnp.allclose(out, _reference_normalize(feats), atol=1e-5, rtol=1e-5)

    # (b) generic NCHW Normalize (channel-wise L2 over dim 1).
    x1 = jax.random.normal(ks[1], (2, 4, 16, 16), dtype=jnp.float32)
    out1 = jax.block_until_ready(l2_normalize(x1))
    assert out1.shape == x1.shape and out1.dtype == x1.dtype
    assert jnp.allclose(out1, _reference_normalize(x1), atol=1e-5, rtol=1e-5)

    # Ragged spatial size exercises the lane-padding path.
    x2 = jax.random.normal(ks[2], (2, 4, 15, 15), dtype=jnp.float32)
    out2 = jax.block_until_ready(l2_normalize(x2))
    assert out2.shape == x2.shape and out2.dtype == x2.dtype
    assert jnp.allclose(out2, _reference_normalize(x2), atol=1e-5, rtol=1e-5)

    # (c) fused contrastive branch: pool -> mapping (Linear/ReLU/Linear) -> l2_norm.
    xh = jax.random.normal(ks[3], (2, 256, 8, 8), dtype=jnp.float32)
    w1 = jax.random.normal(ks[4], (256, 128), dtype=jnp.float32) * 0.05
    b1 = jax.random.normal(ks[5], (128,), dtype=jnp.float32) * 0.05
    w2 = jax.random.normal(ks[6], (128, 128), dtype=jnp.float32) * 0.05
    b2 = jax.random.normal(ks[7], (128,), dtype=jnp.float32) * 0.05
    outh = jax.block_until_ready(contrast_feature_head(xh, w1, b1, w2, b2))
    refh = _reference_head(xh, w1, b1, w2, b2)
    assert outh.shape == (2, 128) and outh.dtype == xh.dtype
    assert jnp.allclose(outh, refh, atol=1e-4, rtol=1e-4)

    print("KERNEL_OK")
</pallas_src>

<mosaic_0001>
module attributes {stable_mosaic.version = 11 : i64} {
  func.func @_l2norm_rows_kernel(%arg0: i32, %arg1: memref<2x128xf32, #tpu.memory_space<vmem>>, %arg2: memref<2x128xf32, #tpu.memory_space<vmem>>) attributes {dimension_semantics = [#tpu.dimension_semantics<parallel>], iteration_bounds = array<i64: 1>, scalar_prefetch = 0 : i64, scratch_operands = 0 : i64, tpu.core_type = #tpu.core_type<tc>, window_params = [{transform_indices = @transform_0, window_bounds = array<i64: 2, 128>}, {transform_indices = @transform_1, window_bounds = array<i64: 2, 128>}]} {
    %c0 = arith.constant 0 : index
    %c0_0 = arith.constant 0 : index
    %0 = vector.load %arg1[%c0, %c0_0] : memref<2x128xf32, #tpu.memory_space<vmem>>, vector<2x128xf32>
    %1 = arith.mulf %0, %0 : vector<2x128xf32>
    %cst = arith.constant dense<0.000000e+00> : vector<2xf32>
    %2 = vector.multi_reduction <add>, %1, %cst [1] : vector<2x128xf32> to vector<2xf32>
    %3 = vector.shape_cast %2 : vector<2xf32> to vector<2x1xf32>
    %4 = math.rsqrt %3 : vector<2x1xf32>
    %5 = vector.broadcast %4 : vector<2x1xf32> to vector<2x128xf32>
    %6 = arith.mulf %0, %5 : vector<2x128xf32>
    %c0_1 = arith.constant 0 : index
    %c0_2 = arith.constant 0 : index
    %7 = vector.load %arg2[%c0_1, %c0_2] : memref<2x128xf32, #tpu.memory_space<vmem>>, vector<2x128xf32>
    tpu.vector_store %arg2[%c0_1, %c0_2], %6 {strides = array<i32>} : memref<2x128xf32, #tpu.memory_space<vmem>>, vector<2x128xf32>,
    return
  }
  func.func @transform_0(%arg0: i32) -> (i32, i32) {
    %c0_i32 = arith.constant 0 : i32
    %c0_i32_0 = arith.constant 0 : i32
    return %arg0, %c0_i32 : i32, i32
  }
  func.func @transform_1(%arg0: i32) -> (i32, i32) {
    %c0_i32 = arith.constant 0 : i32
    %c0_i32_0 = arith.constant 0 : i32
    return %arg0, %c0_i32 : i32, i32
  }
}

</mosaic_0001>

<bundles_post_ra>
// kernel: tpu_custom_call.1
= control target key start
LH: loop header
LB: loop body
LE: loop exit
PB: predicated region body
PF: predicated region fallthrough
CT: control target
= control target key end

     0   :  { %6 = vsyncpa [#allocation3], 0  ;;  %s133_s0 = inlined_call_operand.hbm [shape: f32[2,128], index: 0, kind: input, shape index: {}]   ;;  %s134_s1 = inlined_call_operand.hbm [shape: f32[2,128], index: 1, kind: output, shape index: {}]  }
   0x1   :  { %7 = vsyncpa [#allocation4], 0  ;;  %s97_s6 = smov [#allocation2]   ;;  %s49_s10 = scalar_lea.hbm %s133_s0, 32 }
   0x2   :  { %s14_s7 = sshll.u32 %s97_s6, 4  ;;  %p50_p0 = scmp.ne.s32.totalorder %s133_s0, %s49_s10  ;;  %s15_s7 = int_to_ptr.vmem [resolvable:$true] %s14_s7 }
   0x3   :  { %p53_p1 = scmp.lt.u32.totalorder %s49_s10, %s133_s0 }
   0x5   :  { %p55_p2 = pnand %p53_p1, %p50_p0 }
   0x7   :  { %58 = shalt.err (!%p55_p2)
}
   0x8   :  { %s59_s15 = scalar_lea.vmem %s15_s7, 32  ;;  %p64_p4 = scmp.lt.s32.totalorder %s15_s7, %s15_s7 }
   0x9   :  { %p60_p3 = scmp.ne.s32.totalorder %s15_s7, %s59_s15  ;;  %p65_p5 = scmp.lt.s32.totalorder %s59_s15, %s59_s15 }
   0xb   :  { %p66_p6 = por %p65_p5, %p64_p4 }
   0xd   :  { %p67_p7 = pnand %p66_p6, %p60_p3 }
   0xf   :  { %70 = shalt.err (!%p67_p7)
}
  0x10   :  { %17 = dma.hbm_to_vmem [thread:$0]  %s133_s0, 32, %s15_s7, [#allocation3]  }
  0x11   :  { %93 = dma.done.wait [#allocation3], 32  }
  0x12   :  { %94 = vsyncadd [#allocation3], 4294967264  ;;  %v21_v0 = vld [vmem:[#allocation2] sm:$0x3]  ;;  %vm23_vm0 = vcmask 1041408   ;;  %s98_s18 = smov [#allocation5]  }
  0x13   :  { %v22_v1 = vmul.f32 %v21_v0, %v21_v0  ;;  %s36_s19 = sshll.u32 %s98_s18, 4  ;;  %s37_s19 = int_to_ptr.vmem [resolvable:$true] %s36_s19 }
  0x14   :  { %s71_s20 = scalar_lea.vmem %s37_s19, 32  ;;  %p76_p9 = scmp.lt.s32.totalorder %s37_s19, %s37_s19 }
  0x15   :  { %v24_v2 = vsel %vm23_vm0, %v22_v1, 0.0  ;;  %p72_p8 = scmp.ne.s32.totalorder %s37_s19, %s71_s20  ;;  %p77_p10 = scmp.lt.s32.totalorder %s71_s20, %s71_s20 }
  0x16   :  { %25 = vadd.xlane.f32.xlu0 %v24_v2 }
  0x17   :  { %p78_p11 = por %p77_p10, %p76_p9 }
  0x19   :  { %p79_p12 = pnand %p78_p11, %p72_p8 }
  0xa3   :  { %v26_v3 = vpop.xlane.xlu0 %25 }
  0xa4   :  { %47 = vrsqrt.f32 %v26_v3 }
  0xae   :  { %v48_v4 = vpop.eup %47 }
  0xaf   :  { %v28_v5 = vmul.f32 %v48_v4, %v21_v0 }
  0xb1   :  { %29 = vst [vmem:[#allocation5] sm:$0x3] %v28_v5 }
  0xb2   :  { %82 = shalt.err (!%p79_p12)
}
  0xb3   :  { %s83_s22 = scalar_lea.hbm %s134_s1, 32 }
  0xb4   :  { %p84_p13 = scmp.ne.s32.totalorder %s134_s1, %s83_s22  ;;  %p87_p0 = scmp.lt.u32.totalorder %s83_s22, %s134_s1 }
  0xb6   :  { %p89_p1 = pnand %p87_p0, %p84_p13 }
  0xb8   :  { %92 = shalt.err (!%p89_p1)
}
  0xb9   :  { %39 = dma.vmem_to_hbm [thread:$0]  %s37_s19, 32, %s134_s1, [#allocation4]  }
  0xba   :  { %95 = dma.done.wait [#allocation4], 32  }
  0xbb   :  { %96 = vsyncadd [#allocation4], 4294967264 }
  0xbc   :  { %43 = vsyncpa [#allocation3], 1 }
  0xbd   :  { %44 = vsyncpa [#allocation4], 1 }

</bundles_post_ra>
